<compile_context>
chip_gen: v7x
topology: tpu7x:2x2x1
jax: 0.10.0
libtpu: 0.0.40
codegen_flags: <defaults>
</compile_context>

<pallas_src>
import math
import functools

import jax
import jax.numpy as jnp
from jax import lax
from jax.experimental import pallas as pl
from jax.experimental.pallas import tpu as pltpu


# ----------------------------------------------------------------------------
# Glue: to_dense_batch equivalent (assumes `batch` is sorted, as in PyG)
# ----------------------------------------------------------------------------
def _positions_in_batch(batch, num_batches):
    counts = jnp.bincount(batch, length=num_batches)
    offsets = jnp.concatenate(
        [jnp.zeros((1,), counts.dtype), jnp.cumsum(counts)[:-1]])
    return jnp.arange(batch.shape[0]) - offsets[batch]


def _scatter_to_dense(x_flat, batch, pos, num_batches, max_len):
    dense = jnp.zeros((num_batches, max_len, x_flat.shape[-1]), x_flat.dtype)
    return dense.at[batch, pos].set(x_flat)


def to_dense_batch(x, batch, num_batches, max_len):
    pos = _positions_in_batch(batch, num_batches)
    dense = _scatter_to_dense(x, batch, pos, num_batches, max_len)
    mask = jnp.zeros((num_batches, max_len), bool).at[batch, pos].set(True)
    return dense, mask


def _round_up(n, m):
    return ((n + m - 1) // m) * m


# ----------------------------------------------------------------------------
# Pallas kernel: masked multi-head attention core.
# Inputs/outputs are merged-head ([L, H*dh], lane-dense); the head split/merge
# happens on the tiny VMEM tiles (2-D transposes + free major-dim reshapes).
# ----------------------------------------------------------------------------
def _attn_kernel(lens_ref, q_ref, k_ref, v_ref, o_ref, *,
                 scale, num_heads, dim_head, mask_keys, transpose_scores):
    H, dh = num_heads, dim_head
    D = H * dh
    tb = k_ref.shape[0]
    Lq = q_ref.shape[1]
    Lk = k_ref.shape[1]
    b = pl.program_id(0)

    # Static unroll over the batch elements of this block (amortizes the
    # ~0.35us per-grid-step pipeline overhead when tb > 1).
    for t in range(tb):
        q2 = q_ref[0 if q_ref.shape[0] == 1 else t]     # [Lq, D] projected q
        k2 = k_ref[t]                                   # [Lk, D]
        v2 = v_ref[t]                                   # [Lk, D]

        # Head split in VMEM: [L, H*dh] -> [H, dh, L] via a 2-D transpose plus
        # a free major-dim reshape (dh == sublane tile). Scale folded into q.
        qhd = (q2 * scale).T.reshape(H, dh, Lq)         # [H, dh, Lq]
        khd = k2.T.reshape(H, dh, Lk)                   # [H, dh, Lk]
        vhd = v2.T.reshape(H, dh, Lk)                   # [H, dh, Lk]

        if not transpose_scores:
            # MAB0-style: Lk is the big (128-padded) axis -> keep it in lanes.
            qh = jnp.transpose(qhd, (0, 2, 1))          # [H, Lq, dh]
            e = jnp.einsum('hqd,hdk->hqk', qh, khd,
                           preferred_element_type=jnp.float32)  # [H, Lq, Lk]
            if mask_keys:
                # single select with a finite bias; masked keys underflow to 0
                # TODO(synk): guard lens == 0 (empty graph) with pl.when if
                # empty batches are possible.
                n_valid = lens_ref[b * tb + t]
                kidx = lax.broadcasted_iota(jnp.int32, (1, 1, Lk), 2)
                e = jnp.where(kidx < n_valid, e, -1e30)
            m = jnp.max(e, axis=-1, keepdims=True)
            p = jnp.exp(e - m)
            denom = jnp.sum(p, axis=-1, keepdims=True)  # [H, Lq, 1]
            # Deferred normalization: PV on unnormalized p, scale the small
            # [H, dh, Lq] result; the reciprocal runs on the (idle) EUP slot.
            out_t = jnp.einsum('hdk,hqk->hdq', vhd, p.astype(v2.dtype),
                               preferred_element_type=jnp.float32)  # [H,dh,Lq]
            inv = pl.reciprocal(denom, approx=True).reshape(H, 1, Lq)
            out_t = out_t * inv
        else:
            # MAB1-style: Lk (= num_inds) is tiny -> compute scores transposed
            # so the long Lq axis sits in lanes and softmax vregs are dense.
            kh = jnp.transpose(khd, (0, 2, 1))          # [H, Lk, dh]
            e = jnp.einsum('hkd,hdq->hkq', kh, qhd,
                           preferred_element_type=jnp.float32)  # [H, Lk, Lq]
            # keys here are the induced points: always valid -> no mask needed
            m = jnp.max(e, axis=1, keepdims=True)
            p = jnp.exp(e - m)
            denom = jnp.sum(p, axis=1, keepdims=True)   # [H, 1, Lq]
            # Lk is tiny, so normalizing p costs the same as scaling the output
            # and avoids a lane->sublane relayout of the denominator.
            p = p * pl.reciprocal(denom, approx=True)
            out_t = jnp.einsum('hdk,hkq->hdq', vhd, p.astype(v2.dtype),
                               preferred_element_type=jnp.float32)  # [H,dh,Lq]

        # Merge heads in VMEM (free major-merge + one 2-D transpose) and store
        # lane-dense [Lq, H*dh]; residual on projected q kept in f32.
        out2 = out_t.reshape(D, Lq).T + q2.astype(jnp.float32)
        o_ref[t] = out2.astype(o_ref.dtype)


def masked_mha(q, k, v, lens_k, *, num_heads, dim_head, mask_keys=True,
               transpose_scores=False, batch_block=None,
               compute_dtype=jnp.float32):
    """q: [B or 1, Lq, H*dh] (merged heads; 1 => shared across batches),
    k/v: [B, Lk, H*dh], lens_k: [B] int32 valid-key counts.
    Returns attention(q,k,v) + q as [B, Lq, H*dh] float32.

    compute_dtype=jnp.bfloat16 halves Q/K/V DMA bytes and doubles MXU
    throughput on v6e/v7x (softmax/residual math stays f32); kept f32 in the
    demo so the correctness check stays tight.
    """
    B, Lk, D = k.shape
    Bq, Lq, _ = q.shape
    assert Bq in (1, B) and D == num_heads * dim_head
    scale = 1.0 / math.sqrt(dim_head)

    # Batch-block size: amortize per-grid-step cost, keep >= 2 grid steps so
    # both v7x TensorCores get work, and stay far below the 64 MiB v7x VMEM
    # budget (blocks are double-buffered by the pipeline).
    per_batch_bytes = 4 * (2 * 2 * (Lq + 2 * Lk) * D + 2 * num_heads * Lq * Lk)
    if batch_block is None:
        tb = max(1, min(B // 2, (8 << 20) // max(per_batch_bytes, 1)))
    else:
        tb = max(1, batch_block)
    while B % tb:
        tb -= 1
    tbq = tb if Bq == B else 1
    # Constant index_map for shared (induced-point) queries: no broadcast in
    # HBM, the block stays resident in VMEM across grid steps.
    q_index = ((lambda b, lens: (b, 0, 0)) if Bq == B
               else (lambda b, lens: (0, 0, 0)))

    kernel = functools.partial(
        _attn_kernel, scale=scale, num_heads=num_heads, dim_head=dim_head,
        mask_keys=mask_keys, transpose_scores=transpose_scores)

    return pl.pallas_call(
        kernel,
        out_shape=jax.ShapeDtypeStruct((B, Lq, D), jnp.float32),
        grid_spec=pltpu.PrefetchScalarGridSpec(
            num_scalar_prefetch=1,
            grid=(B // tb,),
            in_specs=[
                pl.BlockSpec((tbq, Lq, D), q_index),
                pl.BlockSpec((tb, Lk, D), lambda b, lens: (b, 0, 0)),
                pl.BlockSpec((tb, Lk, D), lambda b, lens: (b, 0, 0)),
            ],
            out_specs=pl.BlockSpec((tb, Lq, D), lambda b, lens: (b, 0, 0)),
        ),
        compiler_params=pltpu.CompilerParams(
            dimension_semantics=("parallel",),
            vmem_limit_bytes=32 * 1024 * 1024),
    )(lens_k, q.astype(compute_dtype), k.astype(compute_dtype),
      v.astype(compute_dtype))


# ----------------------------------------------------------------------------
# ISAB forward: projections / FFN stay as dense XLA matmuls (deliberately
# hoisted out of the kernel), attention core in Pallas, merged-head layouts
# everywhere (no split/merge-heads HBM passes), key axis padded to 128 lanes.
# ----------------------------------------------------------------------------
def isab_forward(x, batch, params, *, num_heads, dim_head, num_inds,
                 num_batches, max_len_x, compute_dtype=jnp.float32):
    B = num_batches
    lens_x = jnp.bincount(batch, length=B).astype(jnp.int32)
    pos_x = _positions_in_batch(batch, B)
    # pad the ragged axis to a lane multiple: scores vregs stay dense and the
    # (8,128) BlockSpec rule is trivially satisfied; lens mask handles padding
    Lx = _round_up(max_len_x, 128)

    # ---------------- MAB0: queries = induced points I, keys = x ------------
    p0 = params['mab0']
    qI = params['I'][0] @ p0['wq'] + p0['bq']                 # [num_inds, dim_v]
    k0 = x @ p0['wk'] + p0['bk']                              # flat projections
    v0 = x @ p0['wv'] + p0['bv']
    k0d = _scatter_to_dense(k0, batch, pos_x, B, Lx)          # [B, Lx, dim_v]
    v0d = _scatter_to_dense(v0, batch, pos_x, B, Lx)
    H0 = masked_mha(qI[None], k0d, v0d, lens_x,
                    num_heads=num_heads, dim_head=dim_head,
                    mask_keys=True, transpose_scores=False,
                    compute_dtype=compute_dtype)              # [B, num_inds, dim_v]
    H0 = H0 + jax.nn.relu(H0 @ p0['wo'] + p0['bo'])           # FFN (all rows valid)

    # ---------------- MAB1: queries = x, keys = H0 (dense, all valid) -------
    p1 = params['mab1']
    q1d = _scatter_to_dense(x @ p1['wq'] + p1['bq'], batch, pos_x, B, Lx)
    k1 = H0 @ p1['wk'] + p1['bk']                             # dense batched matmul
    v1 = H0 @ p1['wv'] + p1['bv']
    out_dense = masked_mha(q1d, k1, v1,
                           jnp.full((B,), num_inds, jnp.int32),
                           num_heads=num_heads, dim_head=dim_head,
                           mask_keys=False,                   # induced keys all valid
                           transpose_scores=True,             # Lq in lanes, tiny Lk in sublanes
                           compute_dtype=compute_dtype)       # [B, Lx, dim_v]
    out = out_dense[batch, pos_x]                             # drop padded query rows
    return out + jax.nn.relu(out @ p1['wo'] + p1['bo'])


# ----------------------------------------------------------------------------
# Pure-JAX reference (mirrors the PyTorch ISAB semantics, for correctness)
# ----------------------------------------------------------------------------
def mab_ref(q_flat, k_flat, batch_q, batch_k, p, *,
            num_heads, dim_head, num_batches, max_len_q, max_len_k):
    dim_v = num_heads * dim_head
    q = q_flat @ p['wq'] + p['bq']
    k = k_flat @ p['wk'] + p['bk']
    v = k_flat @ p['wv'] + p['bv']
    qd, mq = to_dense_batch(q, batch_q, num_batches, max_len_q)
    kd, mk = to_dense_batch(k, batch_k, num_batches, max_len_k)
    vd, _ = to_dense_batch(v, batch_k, num_batches, max_len_k)
    qh = qd.reshape(num_batches, max_len_q, num_heads, dim_head)
    kh = kd.reshape(num_batches, max_len_k, num_heads, dim_head)
    vh = vd.reshape(num_batches, max_len_k, num_heads, dim_head)
    e = jnp.einsum('bxhd,byhd->bhxy', qh, kh) / math.sqrt(dim_head)
    mask = mq[:, None, :, None] & mk[:, None, None, :]
    e = jnp.where(mask, e, -jnp.inf)
    alpha = jax.nn.softmax(e, axis=-1)
    alpha = jnp.where(mask, alpha, 0.0)
    out = jnp.einsum('bhxy,byhd->bxhd', alpha, vh) + qh
    out = out.reshape(num_batches, max_len_q, dim_v)
    pos = _positions_in_batch(batch_q, num_batches)
    out = out[batch_q, pos]
    return out + jax.nn.relu(out @ p['wo'] + p['bo'])


def isab_ref(x, batch, params, *, num_heads, dim_head, num_inds,
             num_batches, max_len_x):
    dim_out = num_heads * dim_head
    i_flat = jnp.tile(params['I'], (num_batches, 1, 1)).reshape(-1, dim_out)
    batch_i = jnp.repeat(jnp.arange(num_batches), num_inds)
    H = mab_ref(i_flat, x, batch_i, batch, params['mab0'],
                num_heads=num_heads, dim_head=dim_head,
                num_batches=num_batches, max_len_q=num_inds,
                max_len_k=max_len_x)
    return mab_ref(x, H, batch, batch_i, params['mab1'],
                   num_heads=num_heads, dim_head=dim_head,
                   num_batches=num_batches, max_len_q=max_len_x,
                   max_len_k=num_inds)


# ----------------------------------------------------------------------------
# Deterministic parameter init (mimics nn.Linear / xavier_uniform shapes)
# ----------------------------------------------------------------------------
def init_linear(key, d_in, d_out):
    k1, k2 = jax.random.split(key)
    bound = 1.0 / math.sqrt(d_in)
    w = jax.random.uniform(k1, (d_in, d_out), jnp.float32, -bound, bound)
    b = jax.random.uniform(k2, (1, d_out), jnp.float32, -bound, bound)
    return w, b


def init_mab(key, dim_q, dim_k, dim_v):
    ks = jax.random.split(key, 4)
    wq, bq = init_linear(ks[0], dim_q, dim_v)
    wk, bk = init_linear(ks[1], dim_k, dim_v)
    wv, bv = init_linear(ks[2], dim_k, dim_v)
    wo, bo = init_linear(ks[3], dim_v, dim_v)
    return dict(wq=wq, bq=bq, wk=wk, bk=bk, wv=wv, bv=bv, wo=wo, bo=bo)


def init_isab(key, dim_in, dim_head, num_heads, num_inds):
    dim_out = dim_head * num_heads
    k0, k1, k2 = jax.random.split(key, 3)
    limit = math.sqrt(6.0 / (num_inds + 1))          # xavier_uniform on [1, I, D]
    I = jax.random.uniform(k0, (1, num_inds, dim_out), jnp.float32,
                           -limit, limit)
    return dict(I=I,
                mab0=init_mab(k1, dim_out, dim_in, dim_out),
                mab1=init_mab(k2, dim_in, dim_out, dim_out))


# ----------------------------------------------------------------------------
if __name__ == "__main__":
    # 2 ragged "graphs" (10 and 16 nodes), dim_in=32, 4 heads x 8 = 32,
    # 8 induced points.  Raggedness exercises the scalar-prefetched key mask.
    dim_in, dim_head, num_heads, num_inds = 32, 8, 4, 8
    sizes = (10, 16)
    B = len(sizes)
    max_len_x = max(sizes)
    N = sum(sizes)

    key = jax.random.PRNGKey(0)
    kx, kp = jax.random.split(key)
    x = jax.random.normal(kx, (N, dim_in), jnp.float32)
    batch = jnp.concatenate(
        [jnp.full((s,), i, jnp.int32) for i, s in enumerate(sizes)])

    params = init_isab(kp, dim_in, dim_head, num_heads, num_inds)

    out = isab_forward(x, batch, params,
                       num_heads=num_heads, dim_head=dim_head,
                       num_inds=num_inds, num_batches=B,
                       max_len_x=max_len_x)
    out = jax.block_until_ready(out)

    ref = isab_ref(x, batch, params,
                   num_heads=num_heads, dim_head=dim_head,
                   num_inds=num_inds, num_batches=B,
                   max_len_x=max_len_x)

    assert out.shape == (N, dim_head * num_heads)
    err = float(jnp.max(jnp.abs(out - ref)))
    # tolerance loosened vs 1e-4 because the kernel uses the EUP approximate
    # reciprocal (per perf review) for the deferred softmax normalization.
    assert jnp.allclose(out, ref, atol=5e-3, rtol=5e-3), err
    print("KERNEL_OK")
</pallas_src>

<mosaic_0001>
module attributes {stable_mosaic.version = 11 : i64} {
  func.func @_attn_kernel(%arg0: i32, %arg1: memref<2xi32, #tpu.memory_space<smem>>, %arg2: memref<1x8x32xf32, #tpu.memory_space<vmem>>, %arg3: memref<1x128x32xf32, #tpu.memory_space<vmem>>, %arg4: memref<1x128x32xf32, #tpu.memory_space<vmem>>, %arg5: memref<1x8x32xf32, #tpu.memory_space<vmem>>) attributes {dimension_semantics = [#tpu.dimension_semantics<parallel>], iteration_bounds = array<i64: 2>, scalar_prefetch = 1 : i64, scratch_operands = 0 : i64, tpu.core_type = #tpu.core_type<tc>, window_params = [{pipeline_mode = #tpu.pipeline_mode<synchronous>, transform_indices = @transform_0, window_bounds = array<i64: 1, 8, 32>}, {transform_indices = @transform_1, window_bounds = array<i64: 1, 128, 32>}, {transform_indices = @transform_2, window_bounds = array<i64: 1, 128, 32>}, {transform_indices = @transform_3, window_bounds = array<i64: 1, 8, 32>}]} {
    %c0 = arith.constant 0 : index
    %c0_0 = arith.constant 0 : index
    %c0_1 = arith.constant 0 : index
    %0 = vector.load %arg2[%c0, %c0_0, %c0_1] : memref<1x8x32xf32, #tpu.memory_space<vmem>>, vector<1x8x32xf32>
    %1 = vector.shape_cast %0 : vector<1x8x32xf32> to vector<8x32xf32>
    %c0_2 = arith.constant 0 : index
    %c0_3 = arith.constant 0 : index
    %c0_4 = arith.constant 0 : index
    %2 = vector.load %arg3[%c0_2, %c0_3, %c0_4] : memref<1x128x32xf32, #tpu.memory_space<vmem>>, vector<1x128x32xf32>
    %3 = vector.shape_cast %2 : vector<1x128x32xf32> to vector<128x32xf32>
    %c0_5 = arith.constant 0 : index
    %c0_6 = arith.constant 0 : index
    %c0_7 = arith.constant 0 : index
    %4 = vector.load %arg4[%c0_5, %c0_6, %c0_7] : memref<1x128x32xf32, #tpu.memory_space<vmem>>, vector<1x128x32xf32>
    %5 = vector.shape_cast %4 : vector<1x128x32xf32> to vector<128x32xf32>
    %cst = arith.constant 0.353553385 : f32
    %6 = vector.broadcast %cst : f32 to vector<8x32xf32>
    %7 = arith.mulf %1, %6 : vector<8x32xf32>
    %8 = tpu.transpose %7, [1, 0] : vector<8x32xf32> -> vector<32x8xf32>
    %9 = vector.shape_cast %8 : vector<32x8xf32> to vector<4x8x8xf32>
    %10 = tpu.transpose %3, [1, 0] : vector<128x32xf32> -> vector<32x128xf32>
    %11 = vector.shape_cast %10 : vector<32x128xf32> to vector<4x8x128xf32>
    %12 = tpu.transpose %5, [1, 0] : vector<128x32xf32> -> vector<32x128xf32>
    %13 = vector.shape_cast %12 : vector<32x128xf32> to vector<4x8x128xf32>
    %14 = tpu.transpose %9, [0, 2, 1] : vector<4x8x8xf32> -> vector<4x8x8xf32>
    "tpu.trace_start"() <{level = 10 : i32, message = "hqd,hdk->hqk"}> : () -> ()
    %cst_8 = arith.constant dense<0.000000e+00> : vector<4x8x128xf32>
    %15 = tpu.matmul %14, %11, %cst_8 {dimension_numbers = #tpu.dot_dimension_numbers<[2], [1], [1], [2], [0, 0, 0, 1, 1, 2], [0], [0]>} : vector<4x8x8xf32>, vector<4x8x128xf32>, vector<4x8x128xf32> -> vector<4x8x128xf32>
    "tpu.trace_stop"() : () -> ()
    %c1_i32 = arith.constant 1 : i32
    %16 = arith.muli %arg0, %c1_i32 : i32
    %c0_i32 = arith.constant 0 : i32
    %17 = arith.addi %16, %c0_i32 : i32
    %18 = arith.index_cast %17 : i32 to index
    %19 = memref.load %arg1[%18] : memref<2xi32, #tpu.memory_space<smem>>
    %20 = tpu.iota {dimensions = array<i32: 2>} : vector<1x1x128xi32>
    %21 = vector.broadcast %19 : i32 to vector<1x1x128xi32>
    %22 = arith.cmpi slt, %20, %21 : vector<1x1x128xi32>
    %cst_9 = arith.constant -1.000000e+30 : f32
    %23 = vector.shape_cast %22 : vector<1x1x128xi1> to vector<1x1x128xi1>
    %24 = vector.broadcast %23 : vector<1x1x128xi1> to vector<4x8x128xi1>
    %25 = vector.broadcast %cst_9 : f32 to vector<4x8x128xf32>
    %26 = arith.select %24, %15, %25 : vector<4x8x128xi1>, vector<4x8x128xf32>
    %cst_10 = arith.constant dense<0xFF800000> : vector<4x8xf32>
    %27 = vector.multi_reduction <maximumf>, %26, %cst_10 [2] : vector<4x8x128xf32> to vector<4x8xf32>
    %28 = vector.shape_cast %27 : vector<4x8xf32> to vector<4x8x1xf32>
    %29 = vector.broadcast %28 : vector<4x8x1xf32> to vector<4x8x128xf32>
    %30 = arith.subf %26, %29 : vector<4x8x128xf32>
    %31 = math.exp %30 : vector<4x8x128xf32>
    %cst_11 = arith.constant dense<0.000000e+00> : vector<4x8xf32>
    %32 = vector.multi_reduction <add>, %31, %cst_11 [2] : vector<4x8x128xf32> to vector<4x8xf32>
    %33 = vector.shape_cast %32 : vector<4x8xf32> to vector<4x8x1xf32>
    "tpu.trace_start"() <{level = 10 : i32, message = "hdk,hqk->hdq"}> : () -> ()
    %cst_12 = arith.constant dense<0.000000e+00> : vector<4x8x8xf32>
    %34 = tpu.matmul %13, %31, %cst_12 {dimension_numbers = #tpu.dot_dimension_numbers<[2], [2], [1], [1], [0, 0, 0, 1, 1, 1], [0], [0]>} : vector<4x8x128xf32>, vector<4x8x128xf32>, vector<4x8x8xf32> -> vector<4x8x8xf32>
    "tpu.trace_stop"() : () -> ()
    %35 = tpu.reciprocal %33 {approx = true} : vector<4x8x1xf32> -> vector<4x8x1xf32>
    %36 = vector.shape_cast %35 : vector<4x8x1xf32> to vector<4x1x8xf32>
    %37 = vector.broadcast %36 : vector<4x1x8xf32> to vector<4x8x8xf32>
    %38 = arith.mulf %34, %37 : vector<4x8x8xf32>
    %39 = vector.shape_cast %38 : vector<4x8x8xf32> to vector<32x8xf32>
    %40 = tpu.transpose %39, [1, 0] : vector<32x8xf32> -> vector<8x32xf32>
    %41 = arith.addf %40, %1 : vector<8x32xf32>
    %c0_13 = arith.constant 0 : index
    %c0_14 = arith.constant 0 : index
    %c0_15 = arith.constant 0 : index
    %42 = vector.load %arg5[%c0_13, %c0_14, %c0_15] : memref<1x8x32xf32, #tpu.memory_space<vmem>>, vector<1x8x32xf32>
    %43 = vector.shape_cast %42 : vector<1x8x32xf32> to vector<8x32xf32>
    %44 = vector.shape_cast %41 : vector<8x32xf32> to vector<1x8x32xf32>
    tpu.vector_store %arg5[%c0_13, %c0_14, %c0_15], %44 {strides = array<i32>} : memref<1x8x32xf32, #tpu.memory_space<vmem>>, vector<1x8x32xf32>,
    return
  }
  func.func @transform_0(%arg0: i32, %arg1: memref<2xi32, #tpu.memory_space<smem>>) -> (i32, i32, i32) {
    %c0_i32 = arith.constant 0 : i32
    %c0_i32_0 = arith.constant 0 : i32
    %c0_i32_1 = arith.constant 0 : i32
    %c0_i32_2 = arith.constant 0 : i32
    return %c0_i32, %c0_i32_0, %c0_i32_1 : i32, i32, i32
  }
  func.func @transform_1(%arg0: i32, %arg1: memref<2xi32, #tpu.memory_space<smem>>) -> (i32, i32, i32) {
    %c0_i32 = arith.constant 0 : i32
    %c0_i32_0 = arith.constant 0 : i32
    %c0_i32_1 = arith.constant 0 : i32
    return %arg0, %c0_i32, %c0_i32_0 : i32, i32, i32
  }
  func.func @transform_2(%arg0: i32, %arg1: memref<2xi32, #tpu.memory_space<smem>>) -> (i32, i32, i32) {
    %c0_i32 = arith.constant 0 : i32
    %c0_i32_0 = arith.constant 0 : i32
    %c0_i32_1 = arith.constant 0 : i32
    return %arg0, %c0_i32, %c0_i32_0 : i32, i32, i32
  }
  func.func @transform_3(%arg0: i32, %arg1: memref<2xi32, #tpu.memory_space<smem>>) -> (i32, i32, i32) {
    %c0_i32 = arith.constant 0 : i32
    %c0_i32_0 = arith.constant 0 : i32
    %c0_i32_1 = arith.constant 0 : i32
    return %arg0, %c0_i32, %c0_i32_0 : i32, i32, i32
  }
}

</mosaic_0001>

<bundles_post_ra>
// kernel: tpu_custom_call.1
= control target key start
LH: loop header
LB: loop body
LE: loop exit
PB: predicated region body
PF: predicated region fallthrough
CT: control target
= control target key end

     0   :  { %s1679_s0 = inlined_call_operand.vmem [shape: s32[2], index: 0, kind: input, shape index: {}]   ;;  %s1680_s1 = inlined_call_operand.vmem [shape: f32[1,8,32], index: 1, kind: input, shape index: {}]   ;;  %s1681_s2 = inlined_call_operand.vmem [shape: f32[2,128,32], index: 2, kind: input, shape index: {}]   ;;  %s1682_s3 = inlined_call_operand.vmem [shape: f32[2,128,32], index: 3, kind: input, shape index: {}]   ;;  %s1683_s4 = inlined_call_operand.hbm [shape: f32[2,8,32], index: 4, kind: output, shape index: {}]  }
   0x1   :  { %s9_s17 = sshll.u32 %s1679_s0, 4  ;;  %s10_s17 = int_to_ptr.vmem [resolvable:$true] %s9_s17 }
   0x2   :  { %s1381_s18 = scalar_lea.vmem %s10_s17, 16  ;;  %p1386_p1 = scmp.lt.s32.totalorder %s10_s17, %s10_s17 }
   0x3   :  { %p1382_p0 = scmp.ne.s32.totalorder %s10_s17, %s1381_s18  ;;  %p1387_p2 = scmp.lt.s32.totalorder %s1381_s18, %s1381_s18 }
   0x5   :  { %p1388_p3 = por %p1387_p2, %p1386_p1 }
   0x7   :  { %p1389_p4 = pnand %p1388_p3, %p1382_p0 }
   0x9   :  { %1392 = shalt.err (!%p1389_p4)  }
   0xa   :  { %s1459_s19 = smov [#allocation3]  }
   0xb   :  { %12 = dma.vmem_to_smem %s10_s17, 16, %s1459_s19, [#allocation2] }
   0xc   :  { %1437 = dma.done.wait [#allocation2], 16 }
   0xd   :  { %1438 = vsyncadd [#allocation2], 4294967280 }
   0xe   :  { %14 = sfence }
   0xf   :  { %15 = vsyncpa [#allocation5], 0 }
  0x10   :  { %17 = vsyncpa [#allocation5 + $0x1], 0  ;;  %s1491_s20 = smov 0   ;;  %s1493_s21 = smov 0  }
  0x11   :  { %s1495_s0 = smov 0   ;;  %s1497_s22 = smov 0  }
  0x12 LB: > { %s1512_s23 = sadd.s32 4294967295, %s1457_s22   ;;  %s1248_s24 = sadd.s32 4294967294, %s1457_s22   ;;  %s1457_s22 = sphi %s1497_s22, %s1689_s22   ;;  %s1453_s0 = sphi %s1495_s0, %s1688_s0   ;;  %s1449_s21 = sphi %s1493_s21, %s1687_s21   ;;  %s1445_s20 = sphi %s1491_s20, %s1686_s20  }
  0x13   : > { %s1516_s25 = sadd.s32 1, %s1457_s22   ;;  %s103_s26 = sadd.s32 1, %s1453_s0 }
  0x14   : > { %s100_s27 = ssub.s32 %s1457_s22, %s1516_s25  ;;  %p113_p5 = scmp.ne.s32.totalorder %s1453_s0, %s1449_s21 }
  0x15   : > { %p101_p6 = scmp.eq.s32.totalorder %s100_s27, 0  ;;  %p114_p7 = scmp.eq.s32.totalorder %s1512_s23, 1 }
  0x16   : > { %p119_p8 = scmp.ne.s32.totalorder %s1449_s21, %s1445_s20  ;;  %p120_p9 = scmp.eq.s32.totalorder %s1248_s24, 1 }
  0x17   : > { %s1527_s28 = scalar_select %p101_p6, %s1453_s0, %s103_s26  }
  0x18   : > { %p1529_p10 = por %p114_p7, %p113_p5  ;;  %p1533_p11 = por %p120_p9, %p119_p8 }
  0x19   : > { %p1251_p12 = scmp.ge.s32.totalorder %s1457_s22, 1  ;;  %p157_p13 = scmp.lt.s32.totalorder %s1457_s22, 3 }
  0x1b   : > { %p158_p0 = pnand %p1251_p12, %p157_p13 }
  0x1c   : > { %v1542_v0 = vld [vmem:[%s1680_s1] sm:$0xff] (!%p158_p0)  ;;  %p186_p1 = scmp.lt.s32.totalorder (!%p158_p0), %s1512_s23, 1  ;;  %v1460_v4 = vmov (!%p158_p0), 0.0   ;;  %vm1461_vm0 = vmmov (!%p158_p0), 0   ;;  %vm454_vm1 = vcmask (!%p158_p0), 64512   ;;  %v748_v31 = vlaneseq (!%p158_p0)  ;;  %s747_s12 = sld [smem:[#allocation3 + %s1512_s23]] (!%p158_p0) }
  0x1d   : > { %161 = sbr.rel (%p158_p0) target bundleno = 1053 (0x41d), region = 32  ;;  %v229_v1 = vmul.f32 (!%p158_p0), 0.35355338, %v1542_v0  ;;  %1283 = vmatprep.subr.mxu0 (!%p158_p0), %v1460_v4  ;;  %1288 = vmatprep.subr.mxu1 (!%p158_p0), %v1460_v4  ;;  %s183_s16 = sand.u32 (!%p158_p0), 1, %s1449_s21   ;;  %vm1161_vm3 = vcmask (!%p158_p0), 261120  }
  0x1e   : > { %1285 = vmatprep.mubr.msk.f32.mxu0 (!%p158_p0), %vm1461_vm0, %v1460_v4  ;;  %1290 = vmatprep.mubr.msk.f32.mxu1 (!%p158_p0), %vm1461_vm0, %v1460_v4  ;;  %v749_v32 = vand.u32 (!%p158_p0), 127, %v748_v31  ;;  %v1075_v33 = vshrl.u32 (!%p158_p0), %v748_v31, 7  ;;  %s1252_s17 = sshll.u32 (!%p158_p0), %s183_s16, 3  ;;  %s1262_s18 = sshll.u32 (!%p158_p0), %s1512_s23, 7 }
  0x1f   : > { %230 = vxpose.xlu0.b32.start.end [1/1] (short) (narrow) (!%p158_p0), %v229_v1, 32  ;;  %s185_s19 = scalar_lea.vmem (!%p158_p0), [#allocation4], %s1252_s17  ;;  %s1637_s5 = scalar_lea.hbm (!%p158_p0), %s1683_s4, %s1262_s18 }
  0x20   : > { %v1595_v34 = vsub.s32 (!%p158_p0), %v749_v32, %v1075_v33  ;;  %s1177_s24 = sshll.u32 (!%p158_p0), %s185_s19, 4  ;;  %s1164_s6 = scalar_lea.sflag (!%p158_p0), [#allocation5], %s183_s16  ;;  %s1639_s24 = int_to_ptr.vmem [resolvable:$true] %s1177_s24 }
  0x22   : > { %v750_v35 = vstv (!%p158_p0), %s747_s12 }
  0x23   : > { %vm751_vm2 = vcmp.lt.s32.totalorder (!%p158_p0), %v749_v32, %v750_v35 }
  0x24   : > { %s1547_s7 = scalar_select %p186_p1, %s1512_s23, 1 }
  0x25   : > { %s1462_s23 = smov [#allocation4]  }
  0x26   : > { %s1265_s8 = sshll.u32 %s1547_s7, 7  ;;  %s1393_s7 = scalar_lea.vmem %s1639_s24, 128 }
  0x27   : > { %s1555_s11 = scalar_lea.vmem %s1681_s2, %s1265_s8  ;;  %s1603_s15 = scalar_lea.vmem %s1682_s3, %s1265_s8 }
  0x28   : > { %v197_v2 = vld [vmem:[%s1555_s11] sm:$0xff]  ;;  %v198_v3 = vld [vmem:[%s1555_s11 + $0x8] sm:$0xff]  ;;  %v199_v5 = vld [vmem:[%s1555_s11 + $0x10] sm:$0xff]  ;;  %p1394_p2 = scmp.ne.s32.totalorder %s1639_s24, %s1393_s7  ;;  %s1397_s8 = sshll.u32 %s1462_s23, 4  ;;  %s1398_s8 = int_to_ptr.vmem [resolvable:$false] %s1397_s8 }
  0x29   : > { %v200_v6 = vld [vmem:[%s1555_s11 + $0x18] sm:$0xff]  ;;  %v201_v7 = vld [vmem:[%s1555_s11 + $0x20] sm:$0xff]  ;;  %v202_v8 = vld [vmem:[%s1555_s11 + $0x28] sm:$0xff]  ;;  %s1399_s9 = scalar_lea.vmem %s1398_s8, 256  ;;  %p1400_p5 = scmp.lt.s32.totalorder %s1639_s24, %s1398_s8 }
  0x2a   : > { %v203_v9 = vld [vmem:[%s1555_s11 + $0x30] sm:$0xff]  ;;  %v204_v10 = vld [vmem:[%s1555_s11 + $0x38] sm:$0xff]  ;;  %v205_v11 = vld [vmem:[%s1555_s11 + $0x40] sm:$0xff]  ;;  %p1395_p3 = pnand %p1394_p2, %p1529_p10  ;;  %p1401_p6 = scmp.lt.s32.totalorder %s1399_s9, %s1393_s7 }
  0x2b   : > { %v206_v12 = vld [vmem:[%s1555_s11 + $0x48] sm:$0xff]  ;;  %v207_v13 = vld [vmem:[%s1555_s11 + $0x50] sm:$0xff]  ;;  %v208_v14 = vld [vmem:[%s1555_s11 + $0x58] sm:$0xff] }
  0x2c   : > { %262 = vxpose.xlu0.b32.start [1/16] (narrow) %v197_v2, 32  ;;  %v209_v15 = vld [vmem:[%s1555_s11 + $0x60] sm:$0xff]  ;;  %v210_v16 = vld [vmem:[%s1555_s11 + $0x68] sm:$0xff]  ;;  %v211_v17 = vld [vmem:[%s1555_s11 + $0x70] sm:$0xff]  ;;  %p1396_p4 = pneg %p1395_p3  ;;  %p1402_p7 = por %p1401_p6, %p1400_p5 }
  0x2d   : > { %v212_v18 = vld [vmem:[%s1555_s11 + $0x78] sm:$0xff]  ;;  %v213_v48 = vld [vmem:[%s1603_s15] sm:$0xff]  ;;  %v214_v49 = vld [vmem:[%s1603_s15 + $0x8] sm:$0xff] }
  0x2e   : > { %v215_v50 = vld [vmem:[%s1603_s15 + $0x10] sm:$0xff]  ;;  %v216_v51 = vld [vmem:[%s1603_s15 + $0x18] sm:$0xff]  ;;  %v217_v52 = vld [vmem:[%s1603_s15 + $0x20] sm:$0xff]  ;;  %p1403_p8 = pnand %p1402_p7, %p1396_p4 }
  0x2f   : > { %v218_v53 = vld [vmem:[%s1603_s15 + $0x28] sm:$0xff]  ;;  %v219_v54 = vld [vmem:[%s1603_s15 + $0x30] sm:$0xff]  ;;  %v220_v55 = vld [vmem:[%s1603_s15 + $0x38] sm:$0xff] }
  0x30   : > { %263 = vxpose.xlu0.b32.cont [2/16] (narrow) %v198_v3, 32  ;;  %v221_v56 = vld [vmem:[%s1603_s15 + $0x40] sm:$0xff]  ;;  %v222_v57 = vld [vmem:[%s1603_s15 + $0x48] sm:$0xff]  ;;  %v223_v58 = vld [vmem:[%s1603_s15 + $0x50] sm:$0xff] }
  0x31   : > { %v224_v59 = vld [vmem:[%s1603_s15 + $0x58] sm:$0xff]  ;;  %v225_v60 = vld [vmem:[%s1603_s15 + $0x60] sm:$0xff]  ;;  %v226_v61 = vld [vmem:[%s1603_s15 + $0x68] sm:$0xff] }
  0x32   : > { %v227_v62 = vld [vmem:[%s1603_s15 + $0x70] sm:$0xff]  ;;  %v228_v63 = vld [vmem:[%s1603_s15 + $0x78] sm:$0xff] }
  0x34   : > { %264 = vxpose.xlu0.b32.cont [3/16] (narrow) %v199_v5, 32 }
  0x38   : > { %265 = vxpose.xlu0.b32.cont [4/16] (narrow) %v200_v6, 32 }
  0x3c   : > { %266 = vxpose.xlu0.b32.cont [5/16] (narrow) %v201_v7, 32 }
  0x40   : > { %267 = vxpose.xlu0.b32.cont [6/16] (narrow) %v202_v8, 32 }
  0x44   : > { %268 = vxpose.xlu0.b32.cont [7/16] (narrow) %v203_v9, 32 }
  0x48   : > { %269 = vxpose.xlu0.b32.cont [8/16] (narrow) %v204_v10, 32 }
  0x4c   : > { %270 = vxpose.xlu0.b32.cont [9/16] (narrow) %v205_v11, 32 }
  0x50   : > { %271 = vxpose.xlu0.b32.cont [10/16] (narrow) %v206_v12, 32 }
  0x54   : > { %272 = vxpose.xlu0.b32.cont [11/16] (narrow) %v207_v13, 32 }
  0x58   : > { %273 = vxpose.xlu0.b32.cont [12/16] (narrow) %v208_v14, 32 }
  0x5c   : > { %274 = vxpose.xlu0.b32.cont [13/16] (narrow) %v209_v15, 32 }
  0x60   : > { %275 = vxpose.xlu0.b32.cont [14/16] (narrow) %v210_v16, 32 }
  0x64   : > { %276 = vxpose.xlu0.b32.cont [15/16] (narrow) %v211_v17, 32 }
  0x68   : > { %277 = vxpose.xlu0.b32.end [16/16] (narrow) %v212_v18, 32 }
  0x9f   : > { %v246_v19 = vpop.trf.xlu0 }
  0xa0   : > { %326 = vxpose.xlu1.b32.start.end [1/1] (short) (narrow) %v246_v19, 8 }
  0xa3   : > { %v247_v20 = vpop.trf.xlu0 }
  0xa4   : > { %358 = vxpose.xlu1.b32.start.end [1/1] (short) (narrow) %v247_v20, 8 }
  0xa7   : > { %v248_v21 = vpop.trf.xlu0 }
  0xa8   : > { %390 = vxpose.xlu1.b32.start.end [1/1] (short) (narrow) %v248_v21, 8 }
  0xab   : > { %v249_v22 = vpop.trf.xlu0 }
  0xac   : > { %422 = vxpose.xlu1.b32.start.end [1/1] (short) (narrow) %v249_v22, 8 }
  0xaf   : > { %v278_v23 = vpop.trf.xlu0 }
  0xb0   : > { %1284 = vmatpush3.msra.mxu0 %v278_v23 }
  0xb1   : > { %1293 = vmatprep.subr.mxu0 %v1460_v4 }
  0xb3   : > { %v279_v24 = vpop.trf.xlu0 }
  0xb4   : > { %1289 = vmatpush3.msra.mxu1 %v279_v24 }
  0xb5   : > { %1298 = vmatprep.subr.mxu1 %v1460_v4 }
  0xb7   : > { %v280_v25 = vpop.trf.xlu0 }
  0xbb   : > { %v281_v27 = vpop.trf.xlu0 }
 0x120   : > { %v342_v26 = vpop.trf.xlu1 }
 0x121   : > { %1286 = vmatmul.mubr.msk.f32.vlgmr.msra.gmra.mrb[0].mxu0 %vm454_vm1, %v342_v26 }
 0x122   : > { %1294 = vmatpush3.msra.mxu0 %v280_v25  ;;  %1295 = vmatprep.mubr.msk.f32.mxu0 %vm1461_vm0, %v1460_v4 }
 0x123   : > { %1303 = vmatprep.subr.mxu0 %v1460_v4 }
 0x124   : > { %v374_v28 = vpop.trf.xlu1 }
 0x125   : > { %1291 = vmatmul.mubr.msk.f32.vlgmr.msra.gmra.mrb[0].mxu1 %vm454_vm1, %v374_v28 }
 0x126   : > { %1299 = vmatpush3.msra.mxu1 %v281_v27  ;;  %1300 = vmatprep.mubr.msk.f32.mxu1 %vm1461_vm0, %v1460_v4 }
 0x127   : > { %1308 = vmatprep.subr.mxu1 %v1460_v4 }
 0x128   : > { %v406_v29 = vpop.trf.xlu1 }
 0x129   : > { %1296 = vmatmul.mubr.msk.f32.vlgmr.msra.gmra.mrb[2].mxu0 %vm454_vm1, %v406_v29 }
 0x12a   : > { %1305 = vmatprep.mubr.msk.f32.mxu0 %vm1461_vm0, %v1460_v4 }
 0x12c   : > { %v438_v30 = vpop.trf.xlu1 }
 0x12d   : > { %1301 = vmatmul.mubr.msk.f32.vlgmr.msra.gmra.mrb[2].mxu1 %vm454_vm1, %v438_v30 }
 0x12e   : > { %1310 = vmatprep.mubr.msk.f32.mxu1 %vm1461_vm0, %v1460_v4 }
 0x1f4   : > { %v524_v36 = vpop.f32.mrb[0].mxu0 }
 0x1f5   : > { %v1287_v37 = vpop.f32.mrb[1].mxu0  ;;  %v754_v38 = vsel %vm751_vm2, %v524_v36, -1e+30 }
 0x1f6   : > { %758 = vmax.xlane.f32.xlu1 %v754_v38 }
 0x1f8   : > { %v597_v39 = vpop.f32.mrb[0].mxu1 }
 0x1f9   : > { %v1292_v40 = vpop.f32.mrb[1].mxu1  ;;  %v755_v41 = vsel %vm751_vm2, %v597_v39, -1e+30 }
 0x1fa   : > { %760 = vmax.xlane.f32.xlu1 %v755_v41 }
 0x1fc   : > { %v670_v42 = vpop.f32.mrb[2].mxu0 }
 0x1fd   : > { %v1297_v43 = vpop.f32.mrb[3].mxu0  ;;  %v756_v44 = vsel %vm751_vm2, %v670_v42, -1e+30 }
 0x1fe   : > { %762 = vmax.xlane.f32.xlu1 %v756_v44 }
 0x200   : > { %v743_v45 = vpop.f32.mrb[2].mxu1 }
 0x201   : > { %v1302_v46 = vpop.f32.mrb[3].mxu1  ;;  %v757_v47 = vsel %vm751_vm2, %v743_v45, -1e+30 }
 0x202   : > { %764 = vmax.xlane.f32.xlu1 %v757_v47 }
 0x235   : > { %294 = vxpose.xlu1.b32.start [1/16] (narrow) %v213_v48, 32 }
 0x239   : > { %295 = vxpose.xlu1.b32.cont [2/16] (narrow) %v214_v49, 32 }
 0x23d   : > { %296 = vxpose.xlu1.b32.cont [3/16] (narrow) %v215_v50, 32 }
 0x241   : > { %297 = vxpose.xlu1.b32.cont [4/16] (narrow) %v216_v51, 32 }
 0x245   : > { %298 = vxpose.xlu1.b32.cont [5/16] (narrow) %v217_v52, 32 }
 0x249   : > { %299 = vxpose.xlu1.b32.cont [6/16] (narrow) %v218_v53, 32 }
 0x24d   : > { %300 = vxpose.xlu1.b32.cont [7/16] (narrow) %v219_v54, 32 }
 0x251   : > { %301 = vxpose.xlu1.b32.cont [8/16] (narrow) %v220_v55, 32 }
 0x255   : > { %302 = vxpose.xlu1.b32.cont [9/16] (narrow) %v221_v56, 32 }
 0x259   : > { %303 = vxpose.xlu1.b32.cont [10/16] (narrow) %v222_v57, 32 }
 0x25d   : > { %304 = vxpose.xlu1.b32.cont [11/16] (narrow) %v223_v58, 32 }
 0x261   : > { %305 = vxpose.xlu1.b32.cont [12/16] (narrow) %v224_v59, 32 }
 0x265   : > { %306 = vxpose.xlu1.b32.cont [13/16] (narrow) %v225_v60, 32 }
 0x269   : > { %307 = vxpose.xlu1.b32.cont [14/16] (narrow) %v226_v61, 32 }
 0x26d   : > { %308 = vxpose.xlu1.b32.cont [15/16] (narrow) %v227_v62, 32 }
 0x271   : > { %309 = vxpose.xlu1.b32.end [16/16] (narrow) %v228_v63, 32 }
 0x283   : > { %v759_v1 = vpop.xlane.xlu1 %758 }
 0x284   : > { %v766_v2 = vsub.f32 %v754_v38, %v759_v1 }
 0x286   : > { %v770_v3 = vmul.f32 1.442695, %v766_v2 }
 0x287   : > { %v761_v5 = vpop.xlane.xlu1 %760 }
 0x288   : > { %1365 = vpow2.f32 %v770_v3  ;;  %v767_v6 = vsub.f32 %v755_v41, %v761_v5 }
 0x28a   : > { %v772_v7 = vmul.f32 1.442695, %v767_v6 }
 0x28b   : > { %v763_v8 = vpop.xlane.xlu1 %762 }
 0x28c   : > { %1367 = vpow2.f32 %v772_v7  ;;  %v768_v9 = vsub.f32 %v756_v44, %v763_v8 }
 0x28e   : > { %v774_v10 = vmul.f32 1.442695, %v768_v9 }
 0x28f   : > { %v765_v11 = vpop.xlane.xlu1 %764 }
 0x290   : > { %1369 = vpow2.f32 %v774_v10  ;;  %v769_v12 = vsub.f32 %v757_v47, %v765_v11 }
 0x292   : > { %v1366_v13 = vpop.eup %1365  ;;  %v776_v14 = vmul.f32 1.442695, %v769_v12 }
 0x293   : > { %778 = vadd.xlane.f32.xlu0 %v1366_v13  ;;  %1304 = vmatpush3.xpose.msra.mxu0 %v1366_v13 }
 0x294   : > { %1371 = vpow2.f32 %v776_v14  ;;  %1313 = vmatprep.subr.mxu0 %v1460_v4 }
 0x296   : > { %v1368_v15 = vpop.eup %1367 }
 0x297   : > { %780 = vadd.xlane.f32.xlu0 %v1368_v15  ;;  %1309 = vmatpush3.xpose.msra.mxu1 %v1368_v15 }
 0x298   : > { %1318 = vmatprep.subr.mxu1 %v1460_v4 }
 0x29a   : > { %v1370_v16 = vpop.eup %1369 }
 0x29b   : > { %782 = vadd.xlane.f32.xlu0 %v1370_v16 }
 0x29e   : > { %v1372_v17 = vpop.eup %1371 }
 0x29f   : > { %784 = vadd.xlane.f32.xlu0 %v1372_v17 }
 0x2b5   : > { %v310_v18 = vpop.trf.xlu1 }
 0x2b6   : > { %1306 = vmatmul.mubr.f32.vlgmr.msra.gmra.mrb[4].mxu0 %v310_v18 }
 0x2b7   : > { %1314 = vmatpush3.xpose.msra.mxu0 %v1370_v16  ;;  %1315 = vmatprep.mubr.msk.f32.mxu0 %vm1461_vm0, %v1460_v4 }
 0x2b9   : > { %v311_v19 = vpop.trf.xlu1 }
 0x2ba   : > { %1311 = vmatmul.mubr.f32.vlgmr.msra.gmra.mrb[4].mxu1 %v311_v19 }
 0x2bb   : > { %1319 = vmatpush3.xpose.msra.mxu1 %v1372_v17  ;;  %1320 = vmatprep.mubr.msk.f32.mxu1 %vm1461_vm0, %v1460_v4 }
 0x2bd   : > { %v312_v20 = vpop.trf.xlu1 }
 0x2be   : > { %1316 = vmatmul.mubr.f32.vlgmr.msra.gmra.mrb[6].mxu0 %v312_v20 }
 0x2c1   : > { %v313_v21 = vpop.trf.xlu1 }
 0x2c2   : > { %1321 = vmatmul.mubr.f32.vlgmr.msra.gmra.mrb[6].mxu1 %v313_v21 }
 0x320   : > { %v779_v22 = vpop.xlane.xlu0 %778 }
 0x321   : > { %1373 = vrcp.f32 %v779_v22 }
 0x324   : > { %v781_v23 = vpop.xlane.xlu0 %780 }
 0x325   : > { %1375 = vrcp.f32 %v781_v23 }
 0x328   : > { %v783_v24 = vpop.xlane.xlu0 %782 }
 0x329   : > { %1377 = vrcp.f32 %v783_v24 }
 0x32b   : > { %v1374_v26 = vpop.eup %1373 }
 0x32c   : > { %v785_v25 = vpop.xlane.xlu0 %784  ;;  %v1077_v27 = vrot.slane %v1374_v26, %v1595_v34 }
 0x32d   : > { %1379 = vrcp.f32 %v785_v25 }
 0x32f   : > { %v1376_v28 = vpop.eup %1375 }
 0x330   : > { %v1081_v4 = vrot.slane %v1376_v28, %v1595_v34 }
 0x333   : > { %v1378_v32 = vpop.eup %1377 }
 0x334   : > { %v1085_v37 = vrot.slane %v1378_v32, %v1595_v34 }
 0x337   : > { %v1380_v38 = vpop.eup %1379 }
 0x338   : > { %v1089_v42 = vrot.slane %v1380_v38, %v1595_v34 }
 0x389   : > { %v852_v29 = vpop.f32.mrb[4].mxu0 }
 0x38a   : > { %v1124_v30 = vmul.f32 %v1077_v27, %v852_v29  ;;  %v1307_v31 = vpop.f32.mrb[5].mxu0 }
 0x38c   : > { %1128 = vxpose.xlu0.b32.start [1/4] (short) (narrow) %v1124_v30, 8 }
 0x38d   : > { %v922_v33 = vpop.f32.mrb[4].mxu1 }
 0x38e   : > { %v1125_v35 = vmul.f32 %v1081_v4, %v922_v33  ;;  %v1312_v36 = vpop.f32.mrb[5].mxu1 }
 0x390   : > { %1129 = vxpose.xlu0.b32.cont [2/4] (short) (narrow) %v1125_v35, 8 }
 0x391   : > { %v992_v39 = vpop.f32.mrb[6].mxu0 }
 0x392   : > { %v1126_v40 = vmul.f32 %v1085_v37, %v992_v39  ;;  %v1317_v41 = vpop.f32.mrb[7].mxu0 }
 0x394   : > { %1130 = vxpose.xlu0.b32.cont [3/4] (short) (narrow) %v1126_v40, 8 }
 0x395   : > { %v1062_v43 = vpop.f32.mrb[6].mxu1 }
 0x396   : > { %v1127_v44 = vmul.f32 %v1089_v42, %v1062_v43  ;;  %v1322_v45 = vpop.f32.mrb[7].mxu1 }
 0x398   : > { %1131 = vxpose.xlu0.b32.end [4/4] (short) (narrow) %v1127_v44, 8 }
 0x40c   : > { %v1144_v46 = vpop.trf.xlu0 }
 0x40d   : > { %v1160_v47 = vadd.f32 %v1144_v46, %v1542_v0 }
 0x40f   : > { %1162 = vst.msk [vmem:[%s185_s19] sm:$0xff] %vm1161_vm3, %v1160_v47 }
 0x410   : > { %1406 = shalt.err (!%p1403_p8)
}
 0x411   : > { %s1407_s10 = scalar_lea.hbm %s1637_s5, 128  ;;  %s1411_s13 = scalar_lea.hbm %s1683_s4, 256 }
 0x412   : > { %p1408_p9 = scmp.ne.s32.totalorder %s1637_s5, %s1407_s10  ;;  %p1412_p0 = scmp.lt.u32.totalorder %s1637_s5, %s1683_s4 }
 0x413   : > { %p1413_p1 = scmp.lt.u32.totalorder %s1411_s13, %s1407_s10  ;;  %p1415_p3 = scmp.lt.u32.totalorder %s1407_s10, %s1637_s5 }
 0x414   : > { %p1409_p12 = pnand %p1408_p9, %p1529_p10 }
 0x415   : > { %p1414_p2 = por %p1413_p1, %p1412_p0 }
 0x416   : > { %p1410_p13 = pneg %p1409_p12 }
 0x417   : > { %p1416_p4 = por %p1415_p3, %p1414_p2 }
 0x419   : > { %p1417_p5 = pnand %p1416_p4, %p1410_p13 }
 0x41b   : > { %1420 = shalt.err (!%p1417_p5)
}
 0x41c   : > { %1323 = dma.vmem_to_hbm [thread:$0]  (%p1529_p10), %s1639_s24, 128, %s1637_s5, %s1164_s6  }
 0x41d PF: > { %p1329_p6 = scmp.ge.s32.totalorder %s1457_s22, 2  ;;  %s1189_s16 = sand.u32 1, %s1445_s20  }
 0x41e   : > { %s1190_s17 = scalar_lea.sflag [#allocation5], %s1189_s16 }
 0x41f   : > { %p1326_p7 = pnand %p1329_p6, %p1533_p11 }
 0x421   : > { %1440 = dma.done.wait (!%p1326_p7), %s1190_s17, 128  }
 0x422   : > { %1442 = vsyncadd (!%p1326_p7), %s1190_s17, 4294967168  ;;  %p20_p8 = scmp.ge.s32.totalorder %s1516_s25, 4   ;;  %s1686_s20 = smov %s1449_s21 }
 0x423   : > { %s1687_s21 = smov %s1453_s0  ;;  %s1688_s0 = smov %s1527_s28 }
 0x424   : > { %s1689_s22 = smov %s1516_s25  ;;  %22 = sbr.rel (!%p20_p8) target bundleno = 18 (0x12), region = 70 }
 0x42b   :  { %1195 = vsyncpa [#allocation5], 1 }
 0x42c   :  { %1197 = vsyncpa [#allocation5 + $0x1], 1 }

</bundles_post_ra>
